<compile_context>
chip_gen: v6e
topology: v6e:2x2x1
jax: 0.10.0
libtpu: 0.0.40
codegen_flags: <defaults>
</compile_context>

<pallas_src>
import functools

import jax
import jax.numpy as jnp
from jax import lax
from jax.experimental import pallas as pl
from jax.experimental.pallas import tpu as pltpu


_LANES = 128
_TARGET_BLOCK_BYTES = 4 * 1024 * 1024  # ~1-4 MiB blocks amortize grid-step overhead


def _round_down(x, m):
    return (x // m) * m


def _vmem_budget():
    """(scoped_vmem_limit, per_block_budget), generation aware (v7x: 64 MiB VMEM)."""
    phys = 128 * 1024 * 1024
    try:
        info = pltpu.get_tpu_info()
        phys = int(getattr(info, "vmem_capacity_bytes", phys))
    except Exception:
        pass
    limit = max(16 * 1024 * 1024, min(phys // 2, 64 * 1024 * 1024))
    # Tighter per-block budget on 64 MiB parts (v7x), relaxed on 128 MiB parts.
    divisor = 8 if phys <= 64 * 1024 * 1024 else 6
    return limit, limit // divisor


def _pick_tile(total, align, bytes_per_unit, block_budget):
    """Tile along the blocked axis: `align`-multiple, byte-targeted, >=2 grid steps."""
    if total <= align:
        return total  # single full block is the only legal choice
    bpu = max(bytes_per_unit, 1)
    target = max(align * bpu, min(block_budget, _TARGET_BLOCK_BYTES))
    tile = max(align, _round_down(target // bpu, align))
    # Never collapse to one grid step (v7x megacore + pipelining); >=4 steps
    # once the array is more than a few MiB.
    total_bytes = total * bpu
    min_steps = 4 if total_bytes > 4 * _TARGET_BLOCK_BYTES else 2
    cap = max(align, _round_down(pl.cdiv(total, min_steps), align))
    tile = min(tile, cap)
    return max(align, min(tile, _round_down(total, align)))


# --------------------------- channels_last path ----------------------------

def _ln_last_packed_kernel(x_ref, w_ref, b_ref, o_ref, *, eps, c, k):
    # x_ref: (tile_r, 128) — each packed row holds k logical rows of C channels.
    # w_ref/b_ref: (1, 128) = weight/bias tiled k times across lanes.
    x = x_ref[...].astype(jnp.float32)
    # Segment matrix S (128, k): S[l, j] = 1 iff lane l belongs to segment j.
    # Segmented sums (x @ S) and broadcast-back (stats @ S^T) run on the MXU,
    # which is otherwise idle in this kernel.
    lane = lax.broadcasted_iota(jnp.int32, (_LANES, k), 0)
    seg = lax.broadcasted_iota(jnp.int32, (_LANES, k), 1)
    s_mat = (lane // c == seg).astype(jnp.float32)
    inv_c = jnp.float32(1.0 / c)

    sums = jnp.dot(x, s_mat, preferred_element_type=jnp.float32,
                   precision=lax.Precision.HIGHEST)                    # (tile_r, k)
    mean_b = jnp.dot(sums * inv_c, s_mat.T, preferred_element_type=jnp.float32,
                     precision=lax.Precision.HIGHEST)                  # (tile_r, 128)
    xc = x - mean_b
    var = jnp.dot(xc * xc, s_mat, preferred_element_type=jnp.float32,
                  precision=lax.Precision.HIGHEST) * inv_c             # (tile_r, k)
    inv = lax.rsqrt(var + eps)
    inv_b = jnp.dot(inv, s_mat.T, preferred_element_type=jnp.float32,
                    precision=lax.Precision.HIGHEST)                   # (tile_r, 128)

    w = w_ref[...].astype(jnp.float32)
    b = b_ref[...].astype(jnp.float32)
    o_ref[...] = (xc * (inv_b * w) + b).astype(o_ref.dtype)


def _ln_last_kernel(x_ref, w_ref, b_ref, o_ref, *, eps):
    # x_ref: (tile_rows, C); w_ref/b_ref: (1, C).  Normalize each row over C.
    x = x_ref[...].astype(jnp.float32)
    mean = jnp.mean(x, axis=-1, keepdims=True)
    xc = x - mean
    var = jnp.mean(xc * xc, axis=-1, keepdims=True)       # biased var (matches torch)
    inv = lax.rsqrt(var + eps)
    w = w_ref[...].astype(jnp.float32)
    b = b_ref[...].astype(jnp.float32)
    o_ref[...] = (xc * (inv * w) + b).astype(o_ref.dtype)


def _layernorm_channels_last(x2d, weight, bias, eps, tile_rows=None):
    rows, C = x2d.shape
    vmem_limit, block_budget = _vmem_budget()
    itemsize = max(jnp.dtype(x2d.dtype).itemsize, 4)  # f32 temps dominate VMEM use

    k = _LANES // C if (0 < C < _LANES and _LANES % C == 0) else 0
    use_packed = (tile_rows is None) and k > 1 and rows % k == 0

    if use_packed:
        packed_rows = rows // k
        tile_r = _pick_tile(packed_rows, 8, _LANES * itemsize, block_budget)
        xp = x2d.reshape(packed_rows, _LANES)                       # free reshape
        wp = jnp.tile(weight.reshape(-1), k).reshape(1, _LANES)
        bp = jnp.tile(bias.reshape(-1), k).reshape(1, _LANES)
        y = pl.pallas_call(
            functools.partial(_ln_last_packed_kernel, eps=eps, c=C, k=k),
            out_shape=jax.ShapeDtypeStruct((packed_rows, _LANES), x2d.dtype),
            grid=(pl.cdiv(packed_rows, tile_r),),
            in_specs=[
                pl.BlockSpec((tile_r, _LANES), lambda i: (i, 0)),
                pl.BlockSpec((1, _LANES), lambda i: (0, 0)),
                pl.BlockSpec((1, _LANES), lambda i: (0, 0)),
            ],
            out_specs=pl.BlockSpec((tile_r, _LANES), lambda i: (i, 0)),
            compiler_params=pltpu.CompilerParams(
                dimension_semantics=("parallel",),
                vmem_limit_bytes=vmem_limit,
            ),
        )(xp, wp, bp)
        return y.reshape(rows, C)

    # Plain row-wise path (C >= 128, 128 % C != 0 (e.g. swin's C=96), ragged
    # packing, or explicit tile override).
    if tile_rows is None:
        tile_r = _pick_tile(rows, 8, C * itemsize, block_budget)
    else:
        tile_r = int(tile_rows)
        tile_r = rows if tile_r >= rows else max(8, _round_down(tile_r, 8))

    return pl.pallas_call(
        functools.partial(_ln_last_kernel, eps=eps),
        out_shape=jax.ShapeDtypeStruct((rows, C), x2d.dtype),
        grid=(pl.cdiv(rows, tile_r),),              # ragged last block masked by Pallas
        in_specs=[
            pl.BlockSpec((tile_r, C), lambda i: (i, 0)),
            pl.BlockSpec((1, C), lambda i: (0, 0)),
            pl.BlockSpec((1, C), lambda i: (0, 0)),
        ],
        out_specs=pl.BlockSpec((tile_r, C), lambda i: (i, 0)),
        compiler_params=pltpu.CompilerParams(
            dimension_semantics=("parallel",),
            vmem_limit_bytes=vmem_limit,
        ),
    )(x2d, weight.reshape(1, C), bias.reshape(1, C))


# --------------------------- channels_first path ---------------------------

def _ln_first_kernel(x_ref, w_ref, b_ref, o_ref, *, eps):
    # x_ref/o_ref: (C, tile_hw) (leading batch dim squeezed); w_ref/b_ref: (C, 1).
    # Normalize each spatial column over C (sublane axis); spatial axis stays
    # lane-dense -> unmasked, full-width stores.
    x = x_ref[...].astype(jnp.float32)
    mean = jnp.mean(x, axis=0, keepdims=True)              # (1, tile_hw)
    xc = x - mean
    var = jnp.mean(xc * xc, axis=0, keepdims=True)         # biased var (matches torch)
    inv = lax.rsqrt(var + eps)
    w = w_ref[...].astype(jnp.float32)                     # (C, 1)
    b = b_ref[...].astype(jnp.float32)
    o_ref[...] = (xc * (inv * w) + b).astype(o_ref.dtype)


def _layernorm_channels_first(x3d, weight, bias, eps, tile_hw=None):
    N, C, HW = x3d.shape
    vmem_limit, block_budget = _vmem_budget()
    itemsize = max(jnp.dtype(x3d.dtype).itemsize, 4)

    if tile_hw is None:
        t_hw = _pick_tile(HW, _LANES, C * itemsize, block_budget)
    else:
        t_hw = int(tile_hw)
        t_hw = HW if t_hw >= HW else max(_LANES, _round_down(t_hw, _LANES))

    grid = (N, pl.cdiv(HW, t_hw))                  # ragged last spatial block masked
    return pl.pallas_call(
        functools.partial(_ln_first_kernel, eps=eps),
        out_shape=jax.ShapeDtypeStruct((N, C, HW), x3d.dtype),
        grid=grid,
        in_specs=[
            pl.BlockSpec((None, C, t_hw), lambda n, j: (n, 0, j)),
            pl.BlockSpec((C, 1), lambda n, j: (0, 0)),
            pl.BlockSpec((C, 1), lambda n, j: (0, 0)),
        ],
        out_specs=pl.BlockSpec((None, C, t_hw), lambda n, j: (n, 0, j)),
        compiler_params=pltpu.CompilerParams(
            dimension_semantics=("parallel", "parallel"),
            vmem_limit_bytes=vmem_limit,
        ),
    )(x3d, weight.reshape(C, 1), bias.reshape(C, 1))


# --------------------------------- API --------------------------------------

def layer_norm(x, weight, bias, eps=1e-6, data_format="channels_last",
               tile_rows=None, tile_hw=None):
    """Matches models/swin_mlp.py::LayerNorm.forward."""
    if data_format not in ("channels_last", "channels_first"):
        raise ValueError(f"not support data format '{data_format}'")

    if data_format == "channels_last":
        C = x.shape[-1]
        lead = x.shape[:-1]
        y = _layernorm_channels_last(x.reshape(-1, C), weight, bias, eps, tile_rows)
        return y.reshape(*lead, C)
    else:
        N, C, H, W = x.shape
        # (N, C, H, W) -> (N, C, H*W) is a free, contiguous reshape (no copy).
        y = _layernorm_channels_first(x.reshape(N, C, H * W), weight, bias, eps, tile_hw)
        return y.reshape(N, C, H, W)


if __name__ == "__main__":
    key = jax.random.PRNGKey(0)
    N, C, H, W = 2, 4, 16, 16
    k1, k2, k3, k4 = jax.random.split(key, 4)

    # Deterministic parameter init (module __init__: ones / zeros over C).
    weight = jnp.ones((C,), jnp.float32)
    bias = jnp.zeros((C,), jnp.float32)
    eps = 1e-6

    def ref_cf(x):
        mean = x.mean(1, keepdims=True)
        var = ((x - mean) ** 2).mean(1, keepdims=True)
        xn = (x - mean) / jnp.sqrt(var + eps)
        return weight[:, None, None] * xn + bias[:, None, None]

    def ref_cl(x):
        mean = x.mean(-1, keepdims=True)
        var = ((x - mean) ** 2).mean(-1, keepdims=True)
        return (x - mean) / jnp.sqrt(var + eps) * weight + bias

    # channels_first (NCHW) — in-layout sublane reduction, no transposes.
    x_cf = jax.random.normal(k1, (N, C, H, W), jnp.float32)
    y_cf = jax.block_until_ready(layer_norm(x_cf, weight, bias, eps, "channels_first"))
    assert y_cf.shape == (N, C, H, W)
    assert jnp.allclose(y_cf, ref_cf(x_cf), atol=1e-5, rtol=1e-5)

    # channels_last (..., C) — exercises the lane-packed MXU segmented-reduce path
    # (C=4 -> k=32 logical rows per 128-lane packed row, unmasked stores).
    x_cl = jax.random.normal(k2, (N, H, W, C), jnp.float32)
    y_cl = jax.block_until_ready(layer_norm(x_cl, weight, bias, eps, "channels_last"))
    assert y_cl.shape == (N, H, W, C)
    assert jnp.allclose(y_cl, ref_cl(x_cl), atol=1e-5, rtol=1e-5)

    # Ragged last-block paths (no host-side padding): force small tiles so the
    # final block is partial and Pallas' masked loads/stores are exercised.
    x_rag = jax.random.normal(k3, (3, 7, C), jnp.float32)            # rows=21 -> plain path
    y_rag = jax.block_until_ready(
        layer_norm(x_rag, weight, bias, eps, "channels_last", tile_rows=8))
    assert jnp.allclose(y_rag, ref_cl(x_rag), atol=1e-5, rtol=1e-5)

    x_rag_cf = jax.random.normal(k4, (N, C, 10, 13), jnp.float32)    # HW=130, tile=128
    y_rag_cf = jax.block_until_ready(
        layer_norm(x_rag_cf, weight, bias, eps, "channels_first", tile_hw=128))
    assert jnp.allclose(y_rag_cf, ref_cf(x_rag_cf), atol=1e-5, rtol=1e-5)

    print("KERNEL_OK")
</pallas_src>

<mosaic_0001>
module attributes {stable_mosaic.version = 11 : i64} {
  func.func @_ln_first_kernel(%arg0: i32, %arg1: i32, %arg2: memref<1x4x128xf32, #tpu.memory_space<vmem>>, %arg3: memref<4x1xf32, #tpu.memory_space<vmem>>, %arg4: memref<4x1xf32, #tpu.memory_space<vmem>>, %arg5: memref<1x4x128xf32, #tpu.memory_space<vmem>>) attributes {dimension_semantics = [#tpu.dimension_semantics<parallel>, #tpu.dimension_semantics<parallel>], iteration_bounds = array<i64: 2, 2>, scalar_prefetch = 0 : i64, scratch_operands = 0 : i64, tpu.core_type = #tpu.core_type<tc>, window_params = [{transform_indices = @transform_0, window_bounds = array<i64: 1, 4, 128>}, {pipeline_mode = #tpu.pipeline_mode<synchronous>, transform_indices = @transform_1, window_bounds = array<i64: 4, 1>}, {pipeline_mode = #tpu.pipeline_mode<synchronous>, transform_indices = @transform_2, window_bounds = array<i64: 4, 1>}, {transform_indices = @transform_3, window_bounds = array<i64: 1, 4, 128>}]} {
    %c0 = arith.constant 0 : index
    %c0_0 = arith.constant 0 : index
    %c0_1 = arith.constant 0 : index
    %0 = vector.load %arg2[%c0, %c0_0, %c0_1] : memref<1x4x128xf32, #tpu.memory_space<vmem>>, vector<1x4x128xf32>
    %1 = vector.shape_cast %0 : vector<1x4x128xf32> to vector<4x128xf32>
    %cst = arith.constant dense<0.000000e+00> : vector<128xf32>
    %2 = vector.multi_reduction <add>, %1, %cst [0] : vector<4x128xf32> to vector<128xf32>
    %3 = vector.shape_cast %2 : vector<128xf32> to vector<1x128xf32>
    %cst_2 = arith.constant 4.000000e+00 : f32
    %4 = vector.broadcast %cst_2 : f32 to vector<1x128xf32>
    %5 = arith.divf %3, %4 : vector<1x128xf32>
    %6 = vector.broadcast %5 : vector<1x128xf32> to vector<4x128xf32>
    %7 = arith.subf %1, %6 : vector<4x128xf32>
    %8 = arith.mulf %7, %7 : vector<4x128xf32>
    %cst_3 = arith.constant dense<0.000000e+00> : vector<128xf32>
    %9 = vector.multi_reduction <add>, %8, %cst_3 [0] : vector<4x128xf32> to vector<128xf32>
    %10 = vector.shape_cast %9 : vector<128xf32> to vector<1x128xf32>
    %cst_4 = arith.constant 4.000000e+00 : f32
    %11 = vector.broadcast %cst_4 : f32 to vector<1x128xf32>
    %12 = arith.divf %10, %11 : vector<1x128xf32>
    %cst_5 = arith.constant 9.99999997E-7 : f32
    %13 = vector.broadcast %cst_5 : f32 to vector<1x128xf32>
    %14 = arith.addf %12, %13 : vector<1x128xf32>
    %15 = math.rsqrt %14 : vector<1x128xf32>
    %c0_6 = arith.constant 0 : index
    %c0_7 = arith.constant 0 : index
    %16 = vector.load %arg3[%c0_6, %c0_7] : memref<4x1xf32, #tpu.memory_space<vmem>>, vector<4x1xf32>
    %c0_8 = arith.constant 0 : index
    %c0_9 = arith.constant 0 : index
    %17 = vector.load %arg4[%c0_8, %c0_9] : memref<4x1xf32, #tpu.memory_space<vmem>>, vector<4x1xf32>
    %18 = vector.broadcast %15 : vector<1x128xf32> to vector<4x128xf32>
    %19 = vector.broadcast %16 : vector<4x1xf32> to vector<4x128xf32>
    %20 = arith.mulf %18, %19 : vector<4x128xf32>
    %21 = arith.mulf %7, %20 : vector<4x128xf32>
    %22 = vector.broadcast %17 : vector<4x1xf32> to vector<4x128xf32>
    %23 = arith.addf %21, %22 : vector<4x128xf32>
    %c0_10 = arith.constant 0 : index
    %c0_11 = arith.constant 0 : index
    %c0_12 = arith.constant 0 : index
    %24 = vector.load %arg5[%c0_10, %c0_11, %c0_12] : memref<1x4x128xf32, #tpu.memory_space<vmem>>, vector<1x4x128xf32>
    %25 = vector.shape_cast %24 : vector<1x4x128xf32> to vector<4x128xf32>
    %26 = vector.shape_cast %23 : vector<4x128xf32> to vector<1x4x128xf32>
    tpu.vector_store %arg5[%c0_10, %c0_11, %c0_12], %26 {strides = array<i32>} : memref<1x4x128xf32, #tpu.memory_space<vmem>>, vector<1x4x128xf32>,
    return
  }
  func.func @transform_0(%arg0: i32, %arg1: i32) -> (i32, i32, i32) {
    %c0_i32 = arith.constant 0 : i32
    %c0_i32_0 = arith.constant 0 : i32
    return %arg0, %c0_i32, %arg1 : i32, i32, i32
  }
  func.func @transform_1(%arg0: i32, %arg1: i32) -> (i32, i32) {
    %c0_i32 = arith.constant 0 : i32
    %c0_i32_0 = arith.constant 0 : i32
    %c0_i32_1 = arith.constant 0 : i32
    return %c0_i32, %c0_i32_0 : i32, i32
  }
  func.func @transform_2(%arg0: i32, %arg1: i32) -> (i32, i32) {
    %c0_i32 = arith.constant 0 : i32
    %c0_i32_0 = arith.constant 0 : i32
    %c0_i32_1 = arith.constant 0 : i32
    return %c0_i32, %c0_i32_0 : i32, i32
  }
  func.func @transform_3(%arg0: i32, %arg1: i32) -> (i32, i32, i32) {
    %c0_i32 = arith.constant 0 : i32
    %c0_i32_0 = arith.constant 0 : i32
    return %arg0, %c0_i32, %arg1 : i32, i32, i32
  }
}

</mosaic_0001>

<bundles_post_ra>
// kernel: tpu_custom_call.1
= control target key start
LH: loop header
LB: loop body
LE: loop exit
PB: predicated region body
PF: predicated region fallthrough
CT: control target
= control target key end

     0   :  { %8 = vsyncpa [#allocation3], 0  ;;  %s756_s0 = inlined_call_operand.hbm [shape: f32[2,4,256], index: 0, kind: input, shape index: {}]   ;;  %s757_s1 = inlined_call_operand.vmem [shape: f32[4,1], index: 1, kind: input, shape index: {}]   ;;  %s758_s2 = inlined_call_operand.vmem [shape: f32[4,1], index: 2, kind: input, shape index: {}]   ;;  %s759_s3 = inlined_call_operand.hbm [shape: f32[2,4,256], index: 3, kind: output, shape index: {}]  }
   0x1   :  { %10 = vsyncpa [#allocation3 + $0x1], 0 }
   0x2   :  { %11 = vsyncpa [#allocation4], 0 }
   0x3   :  { %13 = vsyncpa [#allocation4 + $0x1], 0  ;;  %s590_s12 = smov 0   ;;  %s592_s13 = smov 0  }
   0x4   :  { %s594_s14 = smov 0   ;;  %s596_s15 = smov 0  }
   0x5   :  { %s598_s16 = smov 0   ;;  %s600_s17 = smov 0  }
   0x6   :  { %s602_s18 = smov 0   ;;  %s604_s19 = smov 0  }
   0x7 LB: > { %s344_s20 = sadd.s32 4294967295, %s565_s19   ;;  %s345_s21 = sadd.s32 4294967294, %s565_s19   ;;  %s565_s19 = sphi %s604_s19, %s19_s19   ;;  %s561_s18 = sphi %s602_s18, %s775_s18   ;;  %s557_s17 = sphi %s600_s17, %s774_s17   ;;  %s553_s16 = sphi %s598_s16, %s773_s16   ;;  %s549_s15 = sphi %s596_s15, %s772_s15   ;;  %s545_s14 = sphi %s594_s14, %s771_s14   ;;  %s541_s13 = sphi %s592_s13, %s770_s13   ;;  %s537_s12 = sphi %s590_s12, %s769_s12  }
   0x8   : > { %s28_s22 = sadd.s32 1, %s557_s17  ;;  %s31_s23 = sadd.s32 1, %s561_s18 }
   0x9   : > { %p29_p0 = scmp.ge.s32.totalorder %s28_s22, 2  ;;  %s40_s24 = sadd.s32 1, %s545_s14 }
   0xa   : > { %p47_p1 = scmp.ne.s32.totalorder %s545_s14, %s541_s13  ;;  %p48_p2 = scmp.eq.s32.totalorder %s565_s19, 0 }
   0xb   : > { %s777_s22 = smov (%p29_p0, %s28_s22), 0  ;;  %s779_s23 = smov (!%p29_p0, %s31_s23), %s561_s18 }
   0xc   : > { %s36_s25 = ssub.s32 %s557_s17, %s777_s22  ;;  %p643_p3 = por %p48_p2, %p47_p1 }
   0xd   : > { %p33_p4 = scmp.ge.s32.totalorder %s779_s23, 2  ;;  %p53_p5 = scmp.ne.s32.totalorder %s541_s13, %s537_s12 }
   0xe   : > { %p54_p6 = scmp.eq.s32.totalorder %s344_s20, 0  ;;  %p121_p7 = scmp.eq.s32.totalorder %s344_s20, 3 }
   0xf   : > { %s781_s23 = smov (%p33_p4, %s779_s23), 0  ;;  %p127_p10 = scmp.eq.s32.totalorder %s345_s21, 3 }
  0x10   : > { %762 = sst [smem:[#allocation8_spill]] %s781_s23  ;;  %p651_p8 = por %p54_p6, %p53_p5 }
  0x11   : > { %p655_p9 = por %p121_p7, %p47_p1  ;;  %s35_s29 = ssub.s32 %s561_s18, %s781_s23 }
  0x12   : > { %s37_s30 = sor.u32 %s36_s25, %s35_s29  ;;  %p661_p12 = por %p127_p10, %p53_p5 }
  0x13   : > { %p38_p11 = scmp.eq.s32.totalorder %s37_s30, 0  ;;  %p371_p13 = scmp.lt.s32.totalorder %s565_s19, 4 }
  0x14   : > { %s765_s4 = scalar_select %p661_p12, 1, 0 }
  0x15   : > { %s153_s5 = sand.u32 1, %s545_s14   ;;  %s349_s8 = sshll.u32 %s561_s18, 1 }
  0x16   : > { %s668_s6 = scalar_select %p38_p11, %s545_s14, %s40_s24  }
  0x17   : > { %s348_s7 = sshll.u32 %s153_s5, 2  ;;  %s162_s9 = sadd.s32 %s557_s17, %s349_s8 }
  0x18   : > { %s157_s10 = scalar_lea.vmem [#allocation2], %s348_s7  ;;  %s350_s20 = sshll.u32 %s162_s9, 6 }
  0x19   : > { %s166_s11 = sshll.u32 %s157_s10, 4  ;;  %s164_s25 = scalar_lea.hbm %s756_s0, %s350_s20  ;;  %s167_s11 = int_to_ptr.vmem [resolvable:$true] %s166_s11 }
  0x1a   : > { %p677_p0 = pnand %p371_p13, %p643_p3  ;;  %p351_p1 = scmp.ge.s32.totalorder %s565_s19, 1 }
  0x1b   : > { %p171_p2 = scmp.lt.s32.totalorder %s565_s19, 5  ;;  %s154_s24 = scalar_lea.sflag [#allocation3], %s153_s5 }
  0x1c   : > { %p443_p4 = pneg %p677_p0  ;;  %s454_s30 = scalar_lea.vmem %s167_s11, 64 }
  0x1d   : > { %p455_p5 = scmp.ne.s32.totalorder %s167_s11, %s454_s30  ;;  %s567_s7 = smov [#allocation2]  }
  0x1e   : > { %s459_s8 = sshll.u32 %s567_s7, 4  ;;  %s460_s8 = int_to_ptr.vmem [resolvable:$false] %s459_s8 }
  0x1f   : > { %p457_p6 = pnand %p455_p5, %p443_p4  ;;  %s461_s23 = scalar_lea.vmem %s460_s8, 128 }
  0x20   : > { %p462_p10 = scmp.lt.s32.totalorder %s167_s11, %s460_s8  ;;  %p463_p11 = scmp.lt.s32.totalorder %s461_s23, %s454_s30 }
  0x21   : > { %p458_p7 = pneg %p457_p6 }
  0x22   : > { %p464_p3 = por %p463_p11, %p462_p10 }
  0x24   : > { %p465_p13 = pnand %p464_p3, %p458_p7 }
  0x26   : > { %468 = shalt.err (!%p465_p13)
}
  0x27   : > { %366 = dma.hbm_to_vmem [thread:$0]  (!%p677_p0), %s164_s25, 64, %s167_s11, %s154_s24  }
  0x28   : > { %p172_p12 = pnand %p351_p1, %p171_p2 }
  0x29   : > { %s692_s26 = sand.u32 (!%p172_p12), 1, %s541_s13  }
  0x2a   : > { %175 = sbr.rel (%p172_p12) target bundleno = 193 (0xc1), region = 32  ;;  %s352_s5 = sshll.u32 (!%p172_p12), %s692_s26, 2 }
  0x2b   : > { %s178_s9 = scalar_lea.sflag (!%p172_p12), [#allocation3], %s692_s26  ;;  %s181_s10 = scalar_lea.vmem (!%p172_p12), [#allocation2], %s352_s5 }
  0x2f   : > { %528 = dma.done.wait (%p651_p8), %s178_s9, 64  }
  0x30   : > { %530 = vsyncadd (%p651_p8), %s178_s9, 4294967232  ;;  %v568_v0 = vmov 0   ;;  %v227_v1 = vld [vmem:[%s757_s1] sm:$0xf]  ;;  %vm205_vm0 = vcmask 1043456   ;;  %s355_s27 = sshll.u32 %s553_s16, 1 }
  0x31   : > { %438 = vset.pattern.permute.xlu0 %v568_v0  ;;  %v228_v2 = vld [vmem:[%s758_s2] sm:$0xf]  ;;  %s255_s29 = sadd.s32 %s549_s15, %s355_s27  ;;  %s203_s30 = scalar_lea.vmem [#allocation5], %s352_s5 }
  0x32   : > { %231 = vperm.xlu0 %438, %v227_v1   ;;  %v204_v3 = vld [vmem:[%s181_s10] sm:$0xf]  ;;  %s356_s24 = sshll.u32 %s255_s29, 6  ;;  %s259_s7 = sshll.u32 %s203_s30, 4  ;;  %s260_s7 = int_to_ptr.vmem [resolvable:$true] %s259_s7 }
  0x33   : > { %v206_v4 = vsel %vm205_vm0, %v204_v3, 0.0  ;;  %s257_s9 = scalar_lea.hbm %s759_s3, %s356_s24  ;;  %s244_s10 = scalar_lea.sflag [#allocation4], %s692_s26 }
  0x34   : > { %v207_v5 = vrot.slane %v206_v4, 4  ;;  %s469_s16 = scalar_lea.vmem %s260_s7, 64  ;;  %s569_s15 = smov [#allocation5]  }
  0x35   : > { %p470_p8 = scmp.ne.s32.totalorder %s260_s7, %s469_s16  ;;  %s473_s11 = sshll.u32 %s569_s15, 4  ;;  %s474_s11 = int_to_ptr.vmem [resolvable:$false] %s473_s11 }
  0x36   : > { %238 = vperm.xlu0 %438, %v228_v2   ;;  %v208_v6 = vadd.f32 %v207_v5, %v206_v4  ;;  %s475_s5 = scalar_lea.vmem %s474_s11, 128  ;;  %p476_p1 = scmp.lt.s32.totalorder %s260_s7, %s474_s11 }
  0x37   : > { %p471_p12 = pnand %p470_p8, %p655_p9  ;;  %p477_p2 = scmp.lt.s32.totalorder %s475_s5, %s469_s16 }
  0x38   : > { %v209_v7 = vrot.slane %v208_v6, 2 }
  0x39   : > { %p472_p0 = pneg %p471_p12  ;;  %p478_p4 = por %p477_p2, %p476_p1 }
  0x3a   : > { %v210_v8 = vadd.f32 %v209_v7, %v208_v6 }
  0x3b   : > { %p479_p5 = pnand %p478_p4, %p472_p0 }
  0x3c   : > { %v211_v9 = vrot.slane %v210_v8, 1 }
  0x3e   : > { %v212_v10 = vadd.f32 %v211_v9, %v210_v8 }
  0x40   : > { %v214_v11 = vmul.f32 0.25, %v212_v10 }
  0x42   : > { %v215_v12 = vsub.f32 %v204_v3, %v214_v11 }
  0x44   : > { %v216_v13 = vmul.f32 %v215_v12, %v215_v12 }
  0x46   : > { %v217_v14 = vsel %vm205_vm0, %v216_v13, 0.0 }
  0x47   : > { %v218_v15 = vrot.slane %v217_v14, 4 }
  0x49   : > { %v219_v16 = vadd.f32 %v218_v15, %v217_v14 }
  0x4b   : > { %v220_v17 = vrot.slane %v219_v16, 2 }
  0x4d   : > { %v221_v18 = vadd.f32 %v220_v17, %v219_v16 }
  0x4f   : > { %v222_v19 = vrot.slane %v221_v18, 1 }
  0x51   : > { %v223_v20 = vadd.f32 %v222_v19, %v221_v18 }
  0x53   : > { %v224_v21 = vmul.f32 0.25, %v223_v20 }
  0x55   : > { %v225_v22 = vadd.f32 1e-06, %v224_v21 }
  0x57   : > { %439 = vrsqrt.f32 %v225_v22 }
  0x64   : > { %v440_v23 = vpop.eup %439 }
  0xad   : > { %v232_v24 = vpop.permute.xlu0 %231 }
  0xae   : > { %v234_v25 = vmul.f32 %v440_v23, %v232_v24 }
  0xb0   : > { %v235_v26 = vmul.f32 %v234_v25, %v215_v12 }
  0xb1   : > { %v239_v27 = vpop.permute.xlu0 %238 }
  0xb2   : > { %v241_v28 = vadd.f32 %v239_v27, %v235_v26 }
  0xb4   : > { %242 = vst [vmem:[%s203_s30] sm:$0xf] %v241_v28 }
  0xb5   : > { %482 = shalt.err (!%p479_p5)
}
  0xb6   : > { %s483_s20 = scalar_lea.hbm %s257_s9, 64  ;;  %s487_s25 = scalar_lea.hbm %s759_s3, 256 }
  0xb7   : > { %p484_p6 = scmp.ne.s32.totalorder %s257_s9, %s483_s20  ;;  %p488_p11 = scmp.lt.s32.totalorder %s257_s9, %s759_s3 }
  0xb8   : > { %p489_p3 = scmp.lt.s32.totalorder %s487_s25, %s483_s20 }
  0xb9   : > { %p485_p7 = pnand %p484_p6, %p655_p9 }
  0xba   : > { %p490_p13 = por %p489_p3, %p488_p11 }
  0xbb   : > { %p486_p10 = pneg %p485_p7 }
  0xbd   : > { %p491_p8 = pnand %p490_p13, %p486_p10 }
  0xbf   : > { %494 = shalt.err (!%p491_p8)
}
  0xc0   : > { %361 = dma.vmem_to_hbm [thread:$0]  (%p655_p9), %s260_s7, 64, %s257_s9, %s244_s10  }
  0xc1 PF: > { %p372_p12 = scmp.ge.s32.totalorder %s565_s19, 2  ;;  %s271_s24 = sand.u32 1, %s537_s12  }
  0xc2   : > { %p767_p0 = scmp.ne.s32.totalorder %s765_s4, 0  ;;  %s272_s30 = scalar_lea.sflag [#allocation4], %s271_s24 }
  0xc4   : > { %p368_p1 = pnand %p372_p12, %p767_p0 }
  0xc6   : > { %p369_p2 = pneg %p368_p1 }
  0xc8   : > { %532 = dma.done.wait (%p369_p2), %s272_s30, 64  }
  0xc9   : > { %534 = vsyncadd (%p369_p2), %s272_s30, 4294967232  ;;  %s19_s19 = sadd.s32 1, %s565_s19   ;;  %s768_s28 = sld [smem:[#allocation8_spill]] }
  0xca   : > { %p16_p4 = scmp.ge.s32.totalorder %s19_s19, 6   ;;  %s769_s12 = smov %s541_s13 }
  0xcb   : > { %s770_s13 = smov %s545_s14  ;;  %s771_s14 = smov %s668_s6 }
  0xcc   : > { %s772_s15 = smov %s557_s17  ;;  %s773_s16 = smov %s561_s18 }
  0xcd   : > { %s774_s17 = smov %s777_s22  ;;  %18 = sbr.rel (!%p16_p4) target bundleno = 7 (0x7), region = 77 }
  0xcf   : > { %s775_s18 = smov %s768_s28 }
  0xd2   :  { %277 = vsyncpa [#allocation3], 1 }
  0xd3   :  { %279 = vsyncpa [#allocation3 + $0x1], 1 }
  0xd4   :  { %280 = vsyncpa [#allocation4], 1 }
  0xd5   :  { %282 = vsyncpa [#allocation4 + $0x1], 1 }

</bundles_post_ra>
